<compile_context>
chip_gen: v7x
topology: tpu7x:2x2x1
jax: 0.10.0
libtpu: 0.0.40
codegen_flags: <defaults>
</compile_context>

<pallas_src>
import jax
import jax.numpy as jnp
from jax import lax
from jax.experimental import pallas as pl
from jax.experimental.pallas import tpu as pltpu


# --------------------------------------------------------------------------- #
# Kernel
# --------------------------------------------------------------------------- #
def _ei_shunt_ln_kernel(x_ref, w_ref, g_ref, b_ref, out_ref, acc_ref):
    """One (batch-tile i, reduction-tile k) grid step.

    x_ref  : (tb, dt)  input rows (samples on sublanes), compute dtype
    w_ref  : (ne, dt)  fused effective weight W_eff = Wex - Wei @ Wix
    g_ref  : (ne, 1)   gain   (broadcast over lanes / batch)
    b_ref  : (ne, 1)   bias   (broadcast over lanes / batch)
    out_ref: (ne, tb)  lane-dense output tile (batch on the 128-lane axis)
    acc_ref: (ne, tb)  f32 z_hat accumulator scratch (carried over the k axis)
    """
    k = pl.program_id(1)

    @pl.when(k == 0)
    def _():
        acc_ref[...] = jnp.zeros_like(acc_ref)

    # Single MXU contraction per step: z_hat += W_eff[:, kslice] @ x[islice, kslice].T
    # Contracting dim 1 of BOTH operands keeps the (ne, tb) lane-dense output
    # without materializing x.T in HBM.
    acc_ref[...] += lax.dot_general(
        w_ref[...], x_ref[...],
        dimension_numbers=(((1,), (1,)), ((), ())),
        preferred_element_type=jnp.float32)

    @pl.when(k == pl.num_programs(1) - 1)
    def _():
        z_hat = acc_ref[...]                                       # (ne, tb) f32
        ne = z_hat.shape[0]
        # Two-pass (centered) layer statistics over the ne units, per sample
        # (== per lane): exact torch semantics (unbiased ddof=1, no epsilon) and
        # no catastrophic-cancellation negative variance.
        mu = jnp.sum(z_hat, axis=0, keepdims=True) * (1.0 / ne)    # (1, tb)
        centered = z_hat - mu
        var = jnp.sum(centered * centered, axis=0, keepdims=True) * (1.0 / (ne - 1))
        inv_std = lax.rsqrt(var)                                   # EUP slot, ~free
        z = g_ref[...] * (centered * inv_std) + b_ref[...]         # (ne, tb)
        # nonlinearity is None in this configuration -> identity.
        out_ref[...] = z.astype(out_ref.dtype)


# --------------------------------------------------------------------------- #
# Tiling / VMEM budget
# --------------------------------------------------------------------------- #
def _vmem_need(tb, dt, ne, c_item, o_item):
    """Rough VMEM footprint of one pipelined configuration (bytes)."""
    return (2 * tb * dt * c_item          # x tile, double-buffered
            + tb * dt * c_item            # headroom for a transposed-operand temp
            + 2 * ne * dt * c_item        # W_eff tile, double-buffered
            + 2 * ne * tb * o_item        # output tile, double-buffered
            + ne * tb * 4                 # f32 accumulator scratch
            + 4 * ne * 4)                 # g, b (double-buffered, tiny)


def _select_tiles(B, D, ne, c_item, o_item, budget, batch_tile_cap,
                  max_reduction_tile):
    """Pick (batch_tile, reduction_tile) that fit the per-generation budget."""
    # Batch tile (output lane axis): multiple of 128 so stores stay unmasked,
    # and small enough that the grid has >= 4 steps when B permits (megacore
    # sharding on v7x + DMA/compute pipelining), capped by batch_tile_cap.
    if B <= 128:
        tb_candidates = [B]                       # single full-dim tile (small B)
    else:
        groups = B // 128
        top = max(1, min(batch_tile_cap // 128, max(1, groups // 4)))
        tb_candidates, m = [], top
        while m >= 1:
            tb_candidates.append(128 * m)
            m //= 2

    # Reduction tile: prefer full D (single K step, W_eff resident); otherwise a
    # 128-multiple that divides D exactly -- a ragged K block would accumulate
    # out-of-bounds garbage, so only exact divisors are allowed.
    dt_candidates = [D]
    if D % 128 == 0:
        q = D // 128
        dt_candidates += [128 * m for m in range(q - 1, 0, -1) if q % m == 0]
    if max_reduction_tile is not None:
        filtered = [dt for dt in dt_candidates if dt <= max_reduction_tile]
        dt_candidates = filtered or [dt_candidates[-1]]

    for tb in tb_candidates:                      # prefer the biggest batch tile,
        for dt in dt_candidates:                  # then the biggest K tile
            if _vmem_need(tb, dt, ne, c_item, o_item) <= budget:
                return tb, dt
    return tb_candidates[-1], dt_candidates[-1]   # smallest config as a fallback


# --------------------------------------------------------------------------- #
# Wrappers
# --------------------------------------------------------------------------- #
def fuse_ei_weights(Wex, Wix, Wei, dtype=jnp.bfloat16):
    """W_eff = Wex - Wei @ Wix (exact matmul associativity), HOISTED out of the
    forward pass: call once per weight update, not per forward call.

    Accuracy note: W_eff is the result of a cancellation; if Wex and Wei@Wix
    nearly cancel, keep dtype=float32 (bf16 halves the weight DMA bytes but the
    relative error of the cancelled result can exceed typical bf16 error)."""
    w = (Wex.astype(jnp.float32)
         - jnp.dot(Wei.astype(jnp.float32), Wix.astype(jnp.float32),
                   preferred_element_type=jnp.float32))
    return w.astype(dtype)


def ei_shunt_layernorm_apply(x, w_eff, g, b, *,
                             out_dtype=jnp.float32,
                             batch_tile_cap=1024,
                             max_reduction_tile=None):
    """Forward pass given the pre-fused weight.

    x: (B, n_input); w_eff: (ne, n_input) in the desired MXU dtype (bf16 default,
    including v5e -- its MXU is bf16-native; only the LN epilogue must be f32,
    which it is); g, b: (ne, 1).  Returns (B, ne) in out_dtype.
    """
    B, D = x.shape
    ne, Dw = w_eff.shape
    assert Dw == D, "w_eff must be (ne, n_input)"
    assert ne >= 2, "unbiased std (ddof=1) needs ne >= 2, matching torch"

    compute_dtype = w_eff.dtype
    x = x.astype(compute_dtype)            # no transpose, no pad: read straight from HBM
    g_col = jnp.asarray(g, jnp.float32).reshape(ne, 1)
    b_col = jnp.asarray(b, jnp.float32).reshape(ne, 1)

    c_item = jnp.dtype(compute_dtype).itemsize
    o_item = jnp.dtype(out_dtype).itemsize

    # Per-generation VMEM budget (v5e/v6e: 128 MiB, v7x: 64 MiB per TensorCore).
    try:
        vmem_cap = int(pltpu.get_tpu_info().vmem_capacity_bytes)
    except Exception:                       # pragma: no cover - conservative fallback
        vmem_cap = 64 * 1024 * 1024
    budget = (vmem_cap * 3) // 4            # leave headroom for Mosaic internals

    tb, dt = _select_tiles(B, D, ne, c_item, o_item, budget,
                           batch_tile_cap, max_reduction_tile)
    nb = pl.cdiv(B, tb)                     # ragged final batch tile is fine:
    nk = pl.cdiv(D, dt)                     #   OOB lanes are masked on writeback

    need = _vmem_need(tb, dt, ne, c_item, o_item)
    vmem_limit = min(vmem_cap, max((need * 5) // 4 + (2 << 20), 32 << 20))

    cost = pl.CostEstimate(
        flops=2 * B * D * ne,
        transcendentals=B,                                          # one rsqrt / sample
        bytes_accessed=int(B * D * c_item                           # x
                           + nb * ne * D * c_item                   # W_eff (per batch tile)
                           + 2 * ne * 4                             # g, b
                           + B * ne * o_item))                      # output

    out_t = pl.pallas_call(
        _ei_shunt_ln_kernel,
        out_shape=jax.ShapeDtypeStruct((ne, B), out_dtype),
        grid_spec=pltpu.PrefetchScalarGridSpec(
            num_scalar_prefetch=0,
            grid=(nb, nk),                   # reduction axis last (innermost)
            in_specs=[
                # x rows; if profiling shows this DMA exposed on v6e/v5e, add
                # pipeline_mode=pl.Buffered(3) here (VMEM budget permitting).
                pl.BlockSpec((tb, dt), lambda i, k: (i, k)),
                pl.BlockSpec((ne, dt), lambda i, k: (0, k)),    # W_eff K-slice
                pl.BlockSpec((ne, 1), lambda i, k: (0, 0)),     # g (resident)
                pl.BlockSpec((ne, 1), lambda i, k: (0, 0)),     # b (resident)
            ],
            out_specs=pl.BlockSpec((ne, tb), lambda i, k: (0, i)),  # lane-dense
            scratch_shapes=[pltpu.VMEM((ne, tb), jnp.float32)],     # z_hat accumulator
        ),
        compiler_params=pltpu.CompilerParams(
            dimension_semantics=("parallel", "arbitrary"),
            vmem_limit_bytes=int(vmem_limit),
        ),
        cost_estimate=cost,
    )(x, w_eff, g_col, b_col)

    # Output transpose is B*ne bytes -- negligible next to the B*D x stream.
    return jnp.swapaxes(out_t, 0, 1)        # (B, ne)


def ei_dense_with_shunt_layernorm(x, Wex, Wix, Wei, g, b, *,
                                  compute_dtype=jnp.bfloat16,
                                  out_dtype=jnp.float32,
                                  batch_tile_cap=1024,
                                  max_reduction_tile=None):
    """Convenience entry point matching the PyTorch module's parameters.

    Prefer calling fuse_ei_weights() once at weight-update time and
    ei_shunt_layernorm_apply() per forward; this helper re-fuses every call.
    """
    w_eff = fuse_ei_weights(Wex, Wix, Wei, compute_dtype)
    return ei_shunt_layernorm_apply(x, w_eff, g, b, out_dtype=out_dtype,
                                    batch_tile_cap=batch_tile_cap,
                                    max_reduction_tile=max_reduction_tile)


# --------------------------------------------------------------------------- #
# Reference + self-test
# --------------------------------------------------------------------------- #
def _reference(x, Wex, Wix, Wei, g, b):
    """Plain-JAX transcription of the PyTorch forward (for verification)."""
    xt = x.T                                 # (D, B)
    ze = Wex @ xt                            # (ne, B)
    zi = Wix @ xt                            # (ni, B)
    z_hat = ze - Wei @ zi                    # (ne, B)
    mu = jnp.mean(z_hat, axis=0, keepdims=True)
    std = jnp.std(z_hat, axis=0, keepdims=True, ddof=1)
    z = g * ((z_hat - mu) / std) + b
    return z.T
# TODO(synk): the module also stashes self.ze/self.zi/self.z and calls retain_grad()
# for autograd inspection; that is training-time bookkeeping with no forward-pass
# Pallas equivalent.


if __name__ == "__main__":
    key = jax.random.PRNGKey(0)

    # --- small shapes consistent with the module: batch=8, n_input=32, ne=16, ni=8 ---
    batch, n_input, ne, ni = 8, 32, 16, 8
    k_x, k_wex, k_wix, k_wei, k_b = jax.random.split(key, 5)
    x = jax.random.normal(k_x, (batch, n_input), dtype=jnp.float32)
    # Deterministic synthetic parameter init (module's init policy is external).
    Wex = jnp.abs(jax.random.normal(k_wex, (ne, n_input), dtype=jnp.float32)) * 0.1
    Wix = jnp.abs(jax.random.normal(k_wix, (ni, n_input), dtype=jnp.float32)) * 0.1
    Wei = jnp.abs(jax.random.normal(k_wei, (ne, ni), dtype=jnp.float32)) * 0.1
    g = jnp.ones((ne, 1), dtype=jnp.float32)                        # torch.ones((ne, 1))
    b = jax.random.normal(k_b, (ne, 1), dtype=jnp.float32) * 0.01

    ref = _reference(x, Wex, Wix, Wei, g, b)

    # f32 compute path: strict check vs reference.
    out_f32 = ei_dense_with_shunt_layernorm(x, Wex, Wix, Wei, g, b,
                                            compute_dtype=jnp.float32)
    out_f32 = jax.block_until_ready(out_f32)
    assert out_f32.shape == (batch, ne)
    assert jnp.allclose(out_f32, ref, atol=1e-4, rtol=1e-4), "f32 mismatch vs reference"

    # Default bf16-MXU path (recommended on v5e/v6e/v7x): loose check.
    out_bf16 = ei_dense_with_shunt_layernorm(x, Wex, Wix, Wei, g, b)
    out_bf16 = jax.block_until_ready(out_bf16)
    assert out_bf16.shape == (batch, ne)
    assert jnp.allclose(out_bf16, ref, atol=1e-1, rtol=1e-1), "bf16 mismatch vs reference"

    # Larger shape exercising the multi-tile batch grid, the K-reduction axis
    # (accumulator + pl.when finalize) and the hoisted weight fusion (f32 so the
    # check stays strict).
    B2, D2, ne2, ni2 = 256, 256, 32, 16
    k2 = jax.random.split(key, 6)
    x2 = jax.random.normal(k2[0], (B2, D2), dtype=jnp.float32)
    Wex2 = jnp.abs(jax.random.normal(k2[1], (ne2, D2), dtype=jnp.float32)) * 0.05
    Wix2 = jnp.abs(jax.random.normal(k2[2], (ni2, D2), dtype=jnp.float32)) * 0.05
    Wei2 = jnp.abs(jax.random.normal(k2[3], (ne2, ni2), dtype=jnp.float32)) * 0.05
    g2 = jnp.ones((ne2, 1), dtype=jnp.float32)
    b2 = jax.random.normal(k2[4], (ne2, 1), dtype=jnp.float32) * 0.01
    ref2 = _reference(x2, Wex2, Wix2, Wei2, g2, b2)

    w_eff2 = fuse_ei_weights(Wex2, Wix2, Wei2, jnp.float32)         # hoisted fusion
    out2 = ei_shunt_layernorm_apply(x2, w_eff2, g2, b2,
                                    batch_tile_cap=128, max_reduction_tile=128)
    out2 = jax.block_until_ready(out2)
    assert out2.shape == (B2, ne2)
    assert jnp.allclose(out2, ref2, atol=1e-3, rtol=1e-3), "tiled-grid mismatch vs reference"

    print("KERNEL_OK")
</pallas_src>

<mosaic_0001>
module attributes {stable_mosaic.version = 11 : i64} {
  func.func @_ei_shunt_ln_kernel(%arg0: i32, %arg1: i32, %arg2: memref<8x32xf32, #tpu.memory_space<vmem>>, %arg3: memref<16x32xf32, #tpu.memory_space<vmem>>, %arg4: memref<16x1xf32, #tpu.memory_space<vmem>>, %arg5: memref<16x1xf32, #tpu.memory_space<vmem>>, %arg6: memref<16x8xf32, #tpu.memory_space<vmem>>, %arg7: memref<16x8xf32, #tpu.memory_space<vmem>>) attributes {dimension_semantics = [#tpu.dimension_semantics<parallel>, #tpu.dimension_semantics<arbitrary>], iteration_bounds = array<i64: 1, 1>, scalar_prefetch = 0 : i64, scratch_operands = 1 : i64, tpu.core_type = #tpu.core_type<tc>, window_params = [{transform_indices = @transform_0, window_bounds = array<i64: 8, 32>}, {transform_indices = @transform_1, window_bounds = array<i64: 16, 32>}, {pipeline_mode = #tpu.pipeline_mode<synchronous>, transform_indices = @transform_2, window_bounds = array<i64: 16, 1>}, {pipeline_mode = #tpu.pipeline_mode<synchronous>, transform_indices = @transform_3, window_bounds = array<i64: 16, 1>}, {transform_indices = @transform_4, window_bounds = array<i64: 16, 8>}]} {
    %c0_i32 = arith.constant 0 : i32
    %0 = arith.cmpi eq, %arg1, %c0_i32 : i32
    %1 = arith.extui %0 : i1 to i32
    %c0_i32_0 = arith.constant 0 : i32
    %2 = arith.cmpi ne, %1, %c0_i32_0 : i32
    scf.if %2 {
      %cst_10 = arith.constant 0.000000e+00 : f32
      %12 = vector.broadcast %cst_10 : f32 to vector<16x8xf32>
      %c0_11 = arith.constant 0 : index
      %c0_12 = arith.constant 0 : index
      %13 = vector.load %arg7[%c0_11, %c0_12] : memref<16x8xf32, #tpu.memory_space<vmem>>, vector<16x8xf32>
      tpu.vector_store %arg7[%c0_11, %c0_12], %12 {strides = array<i32>} : memref<16x8xf32, #tpu.memory_space<vmem>>, vector<16x8xf32>,
    } else {
    }
    %c0 = arith.constant 0 : index
    %c0_1 = arith.constant 0 : index
    %3 = vector.load %arg7[%c0, %c0_1] : memref<16x8xf32, #tpu.memory_space<vmem>>, vector<16x8xf32>
    %c0_2 = arith.constant 0 : index
    %c0_3 = arith.constant 0 : index
    %4 = vector.load %arg3[%c0_2, %c0_3] : memref<16x32xf32, #tpu.memory_space<vmem>>, vector<16x32xf32>
    %c0_4 = arith.constant 0 : index
    %c0_5 = arith.constant 0 : index
    %5 = vector.load %arg2[%c0_4, %c0_5] : memref<8x32xf32, #tpu.memory_space<vmem>>, vector<8x32xf32>
    %cst = arith.constant dense<0.000000e+00> : vector<16x8xf32>
    %6 = tpu.matmul %4, %5, %cst {dimension_numbers = #tpu.dot_dimension_numbers<[1], [1], [0], [0], [0, 0, 1, 0], [], []>} : vector<16x32xf32>, vector<8x32xf32>, vector<16x8xf32> -> vector<16x8xf32>
    %7 = arith.addf %3, %6 : vector<16x8xf32>
    %c0_6 = arith.constant 0 : index
    %c0_7 = arith.constant 0 : index
    %8 = vector.load %arg7[%c0_6, %c0_7] : memref<16x8xf32, #tpu.memory_space<vmem>>, vector<16x8xf32>
    tpu.vector_store %arg7[%c0_6, %c0_7], %7 {strides = array<i32>} : memref<16x8xf32, #tpu.memory_space<vmem>>, vector<16x8xf32>,
    %c0_i32_8 = arith.constant 0 : i32
    %9 = arith.cmpi eq, %arg1, %c0_i32_8 : i32
    %10 = arith.extui %9 : i1 to i32
    %c0_i32_9 = arith.constant 0 : i32
    %11 = arith.cmpi ne, %10, %c0_i32_9 : i32
    scf.if %11 {
      %c0_10 = arith.constant 0 : index
      %c0_11 = arith.constant 0 : index
      %12 = vector.load %arg7[%c0_10, %c0_11] : memref<16x8xf32, #tpu.memory_space<vmem>>, vector<16x8xf32>
      %cst_12 = arith.constant dense<0.000000e+00> : vector<8xf32>
      %13 = vector.multi_reduction <add>, %12, %cst_12 [0] : vector<16x8xf32> to vector<8xf32>
      %14 = vector.shape_cast %13 : vector<8xf32> to vector<1x8xf32>
      %cst_13 = arith.constant 6.250000e-02 : f32
      %15 = vector.broadcast %cst_13 : f32 to vector<1x8xf32>
      %16 = arith.mulf %14, %15 : vector<1x8xf32>
      %17 = vector.broadcast %16 : vector<1x8xf32> to vector<16x8xf32>
      %18 = arith.subf %12, %17 : vector<16x8xf32>
      %19 = arith.mulf %18, %18 : vector<16x8xf32>
      %cst_14 = arith.constant dense<0.000000e+00> : vector<8xf32>
      %20 = vector.multi_reduction <add>, %19, %cst_14 [0] : vector<16x8xf32> to vector<8xf32>
      %21 = vector.shape_cast %20 : vector<8xf32> to vector<1x8xf32>
      %cst_15 = arith.constant 0.0666666701 : f32
      %22 = vector.broadcast %cst_15 : f32 to vector<1x8xf32>
      %23 = arith.mulf %21, %22 : vector<1x8xf32>
      %24 = math.rsqrt %23 : vector<1x8xf32>
      %c0_16 = arith.constant 0 : index
      %c0_17 = arith.constant 0 : index
      %25 = vector.load %arg4[%c0_16, %c0_17] : memref<16x1xf32, #tpu.memory_space<vmem>>, vector<16x1xf32>
      %26 = vector.broadcast %24 : vector<1x8xf32> to vector<16x8xf32>
      %27 = arith.mulf %18, %26 : vector<16x8xf32>
      %28 = vector.broadcast %25 : vector<16x1xf32> to vector<16x8xf32>
      %29 = arith.mulf %28, %27 : vector<16x8xf32>
      %c0_18 = arith.constant 0 : index
      %c0_19 = arith.constant 0 : index
      %30 = vector.load %arg5[%c0_18, %c0_19] : memref<16x1xf32, #tpu.memory_space<vmem>>, vector<16x1xf32>
      %31 = vector.broadcast %30 : vector<16x1xf32> to vector<16x8xf32>
      %32 = arith.addf %29, %31 : vector<16x8xf32>
      %c0_20 = arith.constant 0 : index
      %c0_21 = arith.constant 0 : index
      %33 = vector.load %arg6[%c0_20, %c0_21] : memref<16x8xf32, #tpu.memory_space<vmem>>, vector<16x8xf32>
      tpu.vector_store %arg6[%c0_20, %c0_21], %32 {strides = array<i32>} : memref<16x8xf32, #tpu.memory_space<vmem>>, vector<16x8xf32>,
    } else {
    }
    return
  }
  func.func @transform_0(%arg0: i32, %arg1: i32) -> (i32, i32) {
    %c0_i32 = arith.constant 0 : i32
    return %arg0, %arg1 : i32, i32
  }
  func.func @transform_1(%arg0: i32, %arg1: i32) -> (i32, i32) {
    %c0_i32 = arith.constant 0 : i32
    %c0_i32_0 = arith.constant 0 : i32
    return %c0_i32, %arg1 : i32, i32
  }
  func.func @transform_2(%arg0: i32, %arg1: i32) -> (i32, i32) {
    %c0_i32 = arith.constant 0 : i32
    %c0_i32_0 = arith.constant 0 : i32
    %c0_i32_1 = arith.constant 0 : i32
    return %c0_i32, %c0_i32_0 : i32, i32
  }
  func.func @transform_3(%arg0: i32, %arg1: i32) -> (i32, i32) {
    %c0_i32 = arith.constant 0 : i32
    %c0_i32_0 = arith.constant 0 : i32
    %c0_i32_1 = arith.constant 0 : i32
    return %c0_i32, %c0_i32_0 : i32, i32
  }
  func.func @transform_4(%arg0: i32, %arg1: i32) -> (i32, i32) {
    %c0_i32 = arith.constant 0 : i32
    %c0_i32_0 = arith.constant 0 : i32
    return %c0_i32, %arg0 : i32, i32
  }
}

</mosaic_0001>

<bundles_post_ra>
// kernel: tpu_custom_call.1
= control target key start
LH: loop header
LB: loop body
LE: loop exit
PB: predicated region body
PF: predicated region fallthrough
CT: control target
= control target key end

     0   :  { %vm29_vm0 = vcmask 261120   ;;  %vm21_vm1 = vcmask 64512   ;;  %v202_v2 = vmov 0   ;;  %v203_v3 = vmov 0.0   ;;  %s270_s0 = inlined_call_operand.vmem [shape: f32[8,32], index: 0, kind: input, shape index: {}]   ;;  %s271_s1 = inlined_call_operand.vmem [shape: f32[16,32], index: 1, kind: input, shape index: {}]   ;;  %s272_s2 = inlined_call_operand.vmem [shape: f32[16,1], index: 2, kind: input, shape index: {}]   ;;  %s273_s3 = inlined_call_operand.vmem [shape: f32[16,1], index: 3, kind: input, shape index: {}]   ;;  %s274_s4 = inlined_call_operand.vmem [shape: f32[16,8], index: 4, kind: output, shape index: {}]  }
   0x1   :  { %v28_v0 = vld [vmem:[%s270_s0] sm:$0xff]  ;;  %198 = vset.pattern.permute.xlu0 %v202_v2  ;;  %199 = vset.pattern.permute.xlu1 %v202_v2  ;;  %23 = vst.msk [vmem:[#allocation2 + $0x8] sm:$0xff] %vm21_vm1, %v203_v3  ;;  %22 = vst.msk [vmem:[#allocation2] sm:$0xff] %vm21_vm1, %v203_v3  ;;  %v27_v6 = vld [vmem:[%s271_s1 + $0x8] sm:$0xff] }
   0x2   :  { %v26_v1 = vld [vmem:[%s271_s1] sm:$0xff]  ;;  %191 = vmatprep.subr.msk.mxu0 %vm29_vm0, %v28_v0  ;;  %v150_v7 = vld [vmem:[%s272_s2 + $0x8] sm:$0xff] }
   0x3   :  { %193 = vmatprep.mubr.msk.f32.mxu0 %vm29_vm0, %v26_v1  ;;  %v149_v4 = vld [vmem:[%s272_s2] sm:$0xff]  ;;  %192 = vmatpush3.xpose.msk.msra.mxu0 %vm29_vm0, %v28_v0  ;;  %v166_v8 = vld [vmem:[%s273_s3 + $0x8] sm:$0xff] }
   0x4   :  { %v165_v5 = vld [vmem:[%s273_s3] sm:$0xff]  ;;  %155 = vperm.xlu0 %198, %v149_v4  }
   0x5   :  { %169 = vperm.xlu1 %199, %v165_v5  }
   0x6   :  { %194 = vmatmul.mubr.msk.f32.vlgmr.msra.gmra.mrb[0].mxu0 %vm29_vm0, %v27_v6 }
   0x8   :  { %160 = vperm.xlu0 %198, %v150_v7   ;;  %v25_v9 = vld [vmem:[#allocation2 + $0x8] sm:$0xff]  ;;  %v24_v10 = vld [vmem:[#allocation2] sm:$0xff] }
   0x9   :  { %174 = vperm.xlu1 %199, %v166_v8  }
  0x83   :  { %v156_v41 = vpop.permute.xlu0 %155 }
  0x84   :  { %v170_v42 = vpop.permute.xlu1 %169 }
  0x87   :  { %v161_v46 = vpop.permute.xlu0 %160 }
  0x88   :  { %v175_v49 = vpop.permute.xlu1 %174 }
  0xd9   :  { %v195_v11 = vpop.f32.mrb[0].mxu0 }
  0xda   :  { %v115_v12 = vadd.f32 %v195_v11, %v25_v9  ;;  %v105_v13 = vpop.f32.mrb[1].mxu0 }
  0xdb   :  { %v114_v14 = vadd.f32 %v105_v13, %v24_v10 }
  0xdc   :  { %118 = vst.msk [vmem:[#allocation2 + $0x8] sm:$0xff] %vm21_vm1, %v115_v12 }
  0xdd   :  { %117 = vst.msk [vmem:[#allocation2] sm:$0xff] %vm21_vm1, %v114_v14 }
  0xe3   :  { %v123_v15 = vld [vmem:[#allocation2 + $0x8] sm:$0xff] }
  0xe4   :  { %v122_v16 = vld [vmem:[#allocation2] sm:$0xff]  ;;  %v125_v17 = vsel %vm21_vm1, %v123_v15, 0.0 }
  0xe5   :  { %v124_v18 = vsel %vm21_vm1, %v122_v16, 0.0 }
  0xe6   :  { %v126_v19 = vadd.f32 %v125_v17, %v124_v18 }
  0xe8   :  { %v127_v20 = vrot.slane %v126_v19, 4 }
  0xea   :  { %v128_v21 = vadd.f32 %v127_v20, %v126_v19 }
  0xec   :  { %v129_v22 = vrot.slane %v128_v21, 2 }
  0xee   :  { %v130_v23 = vadd.f32 %v129_v22, %v128_v21 }
  0xf0   :  { %v131_v24 = vrot.slane %v130_v23, 1 }
  0xf2   :  { %v132_v25 = vadd.f32 %v131_v24, %v130_v23 }
  0xf4   :  { %v133_v26 = vmul.f32 0.0625, %v132_v25 }
  0xf6   :  { %v134_v27 = vsub.f32 %v122_v16, %v133_v26  ;;  %v135_v28 = vsub.f32 %v123_v15, %v133_v26 }
  0xf8   :  { %v136_v29 = vmul.f32 %v134_v27, %v134_v27  ;;  %v137_v30 = vmul.f32 %v135_v28, %v135_v28 }
  0xfa   :  { %v138_v31 = vsel %vm21_vm1, %v136_v29, 0.0  ;;  %v139_v32 = vsel %vm21_vm1, %v137_v30, 0.0 }
  0xfb   :  { %v140_v33 = vadd.f32 %v139_v32, %v138_v31 }
  0xfd   :  { %v141_v34 = vrot.slane %v140_v33, 4 }
  0xff   :  { %v142_v35 = vadd.f32 %v141_v34, %v140_v33 }
 0x101   :  { %v143_v36 = vrot.slane %v142_v35, 2 }
 0x103   :  { %v144_v37 = vadd.f32 %v143_v36, %v142_v35 }
 0x105   :  { %v145_v38 = vrot.slane %v144_v37, 1 }
 0x107   :  { %v146_v39 = vadd.f32 %v145_v38, %v144_v37 }
 0x109   :  { %v147_v40 = vmul.f32 0.06666667, %v146_v39 }
 0x10b   :  { %200 = vrsqrt.f32 %v147_v40 }
 0x115   :  { %v201_v43 = vpop.eup %200 }
 0x116   :  { %v151_v44 = vmul.f32 %v201_v43, %v134_v27  ;;  %v152_v45 = vmul.f32 %v201_v43, %v135_v28 }
 0x118   :  { %v163_v47 = vmul.f32 %v156_v41, %v151_v44  ;;  %v164_v48 = vmul.f32 %v161_v46, %v152_v45 }
 0x11a   :  { %v177_v50 = vadd.f32 %v170_v42, %v163_v47  ;;  %v178_v51 = vadd.f32 %v175_v49, %v164_v48 }
 0x11c   :  { %179 = vst.msk [vmem:[%s274_s4] sm:$0xff] %vm21_vm1, %v177_v50  ;;  %180 = vst.msk [vmem:[%s274_s4 + $0x8] sm:$0xff] %vm21_vm1, %v178_v51 }

</bundles_post_ra>
